<compile_context>
chip_gen: v5e
topology: v5e:2x2
jax: 0.10.0
libtpu: 0.0.40
codegen_flags: <defaults>
</compile_context>

<pallas_src>
import math
import jax
import jax.numpy as jnp
from jax.experimental import pallas as pl
from jax.experimental.pallas import tpu as pltpu


def make_positional_encoding(seq_len: int, num_features: int) -> jnp.ndarray:
    """Mirror of the torch __init__ (deterministic buffer, no learned params)."""
    position = jnp.arange(seq_len, dtype=jnp.float32)[:, None]            # (S, 1)
    div_term = jnp.exp(
        jnp.arange(0, num_features, 2, dtype=jnp.float32)
        * -(math.log(10000.0) / num_features)
    )                                                                      # (ceil(F/2),)
    sin_part = jnp.sin(position * div_term)                                # (S, ceil(F/2))
    cos_part = jnp.cos(position * div_term)[:, :-1]                        # (S, ceil(F/2)-1)
    pe = jnp.zeros((seq_len, num_features), dtype=jnp.float32)
    pe = pe.at[:, 0::2].set(sin_part)
    pe = pe.at[:, 1::2].set(cos_part)
    return pe  # torch stores pe[None]; we keep (seq_len, F) and slice in the wrapper


def _add_pe_kernel(x_ref, pe_ref, o_ref):
    # x_ref / o_ref: (b_block, S, F) tiles in VMEM.
    # pe_ref: (S, F) slab, constant block index -> resident across grid steps.
    o_ref[...] = x_ref[...] + pe_ref[...][None, :, :]


def _pick_batch_block(B: int, S: int, target_rows_per_block: int) -> int:
    """Sequences per block: divides B, ~target rows, and >=2 grid steps when B>=2."""
    b_max = max(1, target_rows_per_block // S)        # row budget per block
    if B >= 2:
        b_max = min(b_max, B // 2)                    # >= 2 steps: v7x 2 TCs + pipelining
    b_max = min(b_max, B)
    b = b_max
    while B % b:                                      # largest divisor of B <= b_max
        b -= 1
    return b


def positional_encoding_forward(
    x: jnp.ndarray,
    pe: jnp.ndarray,
    *,
    target_rows_per_block: int = 2048,
    force_pallas: bool = False,
) -> jnp.ndarray:
    """x: (B, S, F); pe: (seq_len, F).  Returns x + pe[None, :x.shape[0]]."""
    B, S, F = x.shape
    # Faithful to torch: slice the buffer by x.size(0); the broadcast is only
    # valid when the slice length equals S.  This assert is load-bearing.
    pe_sliced = pe[:B]
    assert pe_sliced.shape[0] == S, (
        "x + pe[:, :x.size(0)] only broadcasts when the slice length equals S "
        "(i.e. B == S == seq_len)"
    )
    pe_x = pe_sliced.astype(x.dtype)                  # match x.dtype (bf16-safe)

    if not force_pallas and B * S <= 4096:
        # Tiny problem: a single fused XLA elementwise add beats the
        # pallas_call launch overhead.
        return x + pe_x[None, :, :]

    b_block = _pick_batch_block(B, S, target_rows_per_block)
    num_blocks = B // b_block

    # TODO(synk): pe could also be generated in-kernel (EUP slot is idle here)
    # or given pipeline_mode=pl.Buffered(1); both are negligible once the
    # constant block index makes pe a one-time ~S*F fetch, so kept simple.
    return pl.pallas_call(
        _add_pe_kernel,
        out_shape=jax.ShapeDtypeStruct((B, S, F), x.dtype),
        grid=(num_blocks,),
        in_specs=[
            # Last two dims (S, F) equal the full array dims -> no (8,128)
            # divisibility requirement and no feature padding.
            pl.BlockSpec((b_block, S, F), lambda i: (i, 0, 0)),
            # Constant block index -> fetched once, resident in VMEM.
            pl.BlockSpec((S, F), lambda i: (0, 0)),
        ],
        out_specs=pl.BlockSpec((b_block, S, F), lambda i: (i, 0, 0)),
        compiler_params=pltpu.CompilerParams(dimension_semantics=("parallel",)),
    )(x, pe_x)


if __name__ == "__main__":
    seq_len = 8
    num_features = 33          # must be odd — see module __init__ semantics
    B, S, F = 8, 8, 33         # B == S == seq_len so the torch broadcast is valid

    key = jax.random.PRNGKey(0)
    x = jax.random.normal(key, (B, S, F), dtype=jnp.float32)

    pe = make_positional_encoding(seq_len, num_features)

    # force_pallas=True so the kernel path (not the tiny-size XLA fast path)
    # is exercised at this small test shape.
    out = positional_encoding_forward(x, pe, force_pallas=True)
    out = jax.block_until_ready(out)

    # reference (plain JAX) check of the exact forward semantics
    ref = x + pe[None, : x.shape[0], :]
    assert out.shape == (B, S, F)
    assert jnp.allclose(out, ref, atol=1e-6, rtol=1e-6)

    print("KERNEL_OK")
</pallas_src>

<mosaic_0001>
module attributes {stable_mosaic.version = 11 : i64} {
  func.func @_add_pe_kernel(%arg0: i32, %arg1: memref<4x8x33xf32, #tpu.memory_space<vmem>>, %arg2: memref<8x33xf32, #tpu.memory_space<vmem>>, %arg3: memref<4x8x33xf32, #tpu.memory_space<vmem>>) attributes {dimension_semantics = [#tpu.dimension_semantics<parallel>], iteration_bounds = array<i64: 2>, scalar_prefetch = 0 : i64, scratch_operands = 0 : i64, tpu.core_type = #tpu.core_type<tc>, window_params = [{transform_indices = @transform_0, window_bounds = array<i64: 4, 8, 33>}, {pipeline_mode = #tpu.pipeline_mode<synchronous>, transform_indices = @transform_1, window_bounds = array<i64: 8, 33>}, {transform_indices = @transform_2, window_bounds = array<i64: 4, 8, 33>}]} {
    %c0 = arith.constant 0 : index
    %c0_0 = arith.constant 0 : index
    %c0_1 = arith.constant 0 : index
    %0 = vector.load %arg1[%c0, %c0_0, %c0_1] : memref<4x8x33xf32, #tpu.memory_space<vmem>>, vector<4x8x33xf32>
    %c0_2 = arith.constant 0 : index
    %c0_3 = arith.constant 0 : index
    %1 = vector.load %arg2[%c0_2, %c0_3] : memref<8x33xf32, #tpu.memory_space<vmem>>, vector<8x33xf32>
    %2 = vector.shape_cast %1 : vector<8x33xf32> to vector<1x8x33xf32>
    %3 = vector.broadcast %2 : vector<1x8x33xf32> to vector<4x8x33xf32>
    %4 = arith.addf %0, %3 : vector<4x8x33xf32>
    %c0_4 = arith.constant 0 : index
    %c0_5 = arith.constant 0 : index
    %c0_6 = arith.constant 0 : index
    %5 = vector.load %arg3[%c0_4, %c0_5, %c0_6] : memref<4x8x33xf32, #tpu.memory_space<vmem>>, vector<4x8x33xf32>
    tpu.vector_store %arg3[%c0_4, %c0_5, %c0_6], %4 {strides = array<i32>} : memref<4x8x33xf32, #tpu.memory_space<vmem>>, vector<4x8x33xf32>,
    return
  }
  func.func @transform_0(%arg0: i32) -> (i32, i32, i32) {
    %c0_i32 = arith.constant 0 : i32
    %c0_i32_0 = arith.constant 0 : i32
    %c0_i32_1 = arith.constant 0 : i32
    return %arg0, %c0_i32, %c0_i32_0 : i32, i32, i32
  }
  func.func @transform_1(%arg0: i32) -> (i32, i32) {
    %c0_i32 = arith.constant 0 : i32
    %c0_i32_0 = arith.constant 0 : i32
    %c0_i32_1 = arith.constant 0 : i32
    return %c0_i32, %c0_i32_0 : i32, i32
  }
  func.func @transform_2(%arg0: i32) -> (i32, i32, i32) {
    %c0_i32 = arith.constant 0 : i32
    %c0_i32_0 = arith.constant 0 : i32
    %c0_i32_1 = arith.constant 0 : i32
    return %arg0, %c0_i32, %c0_i32_0 : i32, i32, i32
  }
}

</mosaic_0001>

<bundles_post_ra>
// kernel: tpu_custom_call.1
= control target key start
LH: loop header
LB: loop body
LE: loop exit
PB: predicated region body
PF: predicated region fallthrough
CT: control target
= control target key end

     0   :  { %7 = vsyncpa [#allocation3], 0  ;;  %s671_s0 = inlined_call_operand.hbm [shape: f32[8,8,33], index: 0, kind: input, shape index: {}]   ;;  %s672_s1 = inlined_call_operand.hbm [shape: f32[8,33], index: 1, kind: input, shape index: {}]   ;;  %s673_s2 = inlined_call_operand.hbm [shape: f32[8,8,33], index: 2, kind: output, shape index: {}]  }
   0x1   :  { %9 = vsyncpa [#allocation3 + $0x1], 0 }
   0x2   :  { %10 = vsyncpa [#allocation6], 0 }
   0x3   :  { %11 = vsyncpa [#allocation4], 0 }
   0x4   :  { %13 = vsyncpa [#allocation4 + $0x1], 0  ;;  %s525_s9 = smov 0   ;;  %s527_s10 = smov 0  }
   0x5   :  { %s529_s11 = smov 0   ;;  %s531_s12 = smov 0  }
   0x6 LB: > { %s546_s13 = sadd.s32 4294967295, %s503_s12   ;;  %s294_s14 = sadd.s32 4294967294, %s503_s12   ;;  %s503_s12 = sphi %s531_s12, %s684_s12   ;;  %s499_s11 = sphi %s529_s11, %s683_s11   ;;  %s495_s10 = sphi %s527_s10, %s682_s10   ;;  %s491_s9 = sphi %s525_s9, %s681_s9  }
   0x7   : > { %s550_s15 = sadd.s32 1, %s503_s12   ;;  %s26_s16 = sadd.s32 1, %s499_s11 }
   0x8   : > { %s23_s17 = ssub.s32 %s503_s12, %s550_s15  ;;  %p33_p0 = scmp.ne.s32.totalorder %s499_s11, %s495_s10 }
   0x9   : > { %p24_p1 = scmp.eq.s32.totalorder %s23_s17, 0  ;;  %p34_p2 = scmp.eq.s32.totalorder %s503_s12, 0 }
   0xa   : > { %p39_p3 = scmp.ne.s32.totalorder %s495_s10, %s491_s9  ;;  %p40_p4 = scmp.eq.s32.totalorder %s546_s13, 0 }
   0xb   : > { %s562_s18 = scalar_select %p24_p1, %s499_s11, %s26_s16  }
   0xc   : > { %p564_p5 = por %p34_p2, %p33_p0  ;;  %p570_p6 = por %p40_p4, %p39_p3 }
   0xd   : > { %p84_p7 = scmp.eq.s32.totalorder %s546_s13, 1  ;;  %p90_p8 = scmp.eq.s32.totalorder %s294_s14, 1 }
   0xe   : > { %p295_p9 = scmp.ge.s32.totalorder %s503_s12, 1  ;;  %p97_p10 = scmp.lt.s32.totalorder %s503_s12, 3 }
   0xf   : > { %p577_p11 = por %p84_p7, %p33_p0  ;;  %p581_p12 = por %p90_p8, %p39_p3 }
  0x10   : > { %p585_p13 = pnand %p295_p9, %p97_p10  ;;  %s109_s26 = sshll.u32 %s672_s1, 4  ;;  %s110_s26 = int_to_ptr.hbm [resolvable:$true] %s109_s26 }
  0x11   : > { %s505_s27 = smov [#allocation5]   ;;  %p333_p3 = scmp.lt.s32.totalorder %s503_s12, 2 }
  0x12   : > { %p320_p1 = pneg %p585_p13  ;;  %s111_s28 = sshll.u32 %s505_s27, 4  ;;  %s112_s28 = int_to_ptr.vmem [resolvable:$true] %s111_s28 }
  0x13   : > { %s122_s29 = sand.u32 1, %s499_s11   ;;  %p601_p7 = pnand %p333_p3, %p564_p5 }
  0x14   : > { %p321_p2 = pnand %p320_p1, %p40_p4  ;;  %s298_s3 = sshll.u32 %s122_s29, 5 }
  0x15   : > { %s310_s4 = sshll.u32 %s503_s12, 5  ;;  %s126_s14 = scalar_lea.vmem [#allocation2], %s298_s3 }
  0x16   : > { %323 = dma.hbm_to_vmem [thread:$0]  (!%p321_p2), %s110_s26, 128, %s112_s28, [#allocation6]  }
  0x17   : > { %s131_s7 = scalar_lea.hbm %s671_s0, %s310_s4  ;;  %s134_s16 = sshll.u32 %s126_s14, 4  ;;  %s135_s16 = int_to_ptr.vmem [resolvable:$true] %s134_s16 }
  0x18   : > { %s132_s8 = sshll.u32 %s131_s7, 4  ;;  %s123_s17 = scalar_lea.sflag [#allocation3], %s122_s29  ;;  %s133_s8 = int_to_ptr.hbm [resolvable:$true] %s132_s8 }
  0x19   : > { %s403_s24 = sshra.s32 %s133_s8, 4  ;;  %p407_p8 = pneg %p601_p7  ;;  %s404_s24 = int_to_ptr.hbm [resolvable:$true] %s403_s24 }
  0x1a   : > { %s405_s19 = scalar_lea.hbm %s404_s24, 32  ;;  %s410_s27 = scalar_lea.hbm %s671_s0, 64 }
  0x1b   : > { %p406_p5 = scmp.ne.s32.totalorder %s404_s24, %s405_s19  ;;  %p411_p1 = scmp.lt.s32.totalorder %s404_s24, %s671_s0 }
  0x1c   : > { %p412_p2 = scmp.lt.s32.totalorder %s410_s27, %s405_s19 }
  0x1d   : > { %p408_p9 = pnand %p407_p8, %p406_p5 }
  0x1e   : > { %p413_p3 = por %p412_p2, %p411_p1 }
  0x1f   : > { %p409_p10 = pneg %p408_p9 }
  0x21   : > { %p414_p0 = pnand %p413_p3, %p409_p10 }
  0x23   : > { %417 = shalt.err (!%p414_p0)
}
  0x24   : > { %s506_s29 = smov 128   ;;  %s507_s3 = smov 8  }
  0x25   : > { %327 = dma.hbm_to_vmem [thread:$0]  (!%p601_p7), %s133_s8, 512, %s135_s16, %s123_s17, %s506_s29, %s506_s29, %s507_s3  }
  0x26   : > { %146 = sbr.rel (%p585_p13) target bundleno = 62 (0x3e), region = 28  ;;  %s622_s5 = sand.u32 (!%p585_p13), 1, %s495_s10  }
  0x27   : > { %s302_s6 = sshll.u32 (!%p585_p13), %s622_s5, 5  ;;  %s149_s7 = scalar_lea.sflag (!%p585_p13), [#allocation3], %s622_s5 }
  0x28   : > { %s152_s14 = scalar_lea.vmem (!%p585_p13), [#allocation2], %s302_s6 }
  0x2b   : > { %478 = dma.done.wait (%p570_p6), %s149_s7, 512  }
  0x2c   : > { %480 = vsyncadd (%p570_p6), %s149_s7, 4294966784 }
  0x2d   : > { %482 = dma.done.wait (%p40_p4), [#allocation6], 128  }
  0x2e   : > { %484 = vsyncadd (%p40_p4), [#allocation6], 4294967168  ;;  %s311_s23 = sshll.u32 %s546_s13, 5  ;;  %v181_v0 = vld [vmem:[%s152_s14] sm:$0xff]  ;;  %vm190_vm0 = vcmask 269312   ;;  %s178_s17 = scalar_lea.vmem [#allocation7], %s302_s6 }
  0x2f   : > { %s207_s16 = scalar_lea.hbm %s673_s2, %s311_s23  ;;  %v185_v1 = vld [vmem:[#allocation5] sm:$0xff]  ;;  %s208_s24 = sshll.u32 %s178_s17, 4  ;;  %v182_v2 = vld [vmem:[%s152_s14 + $0x8] sm:$0xff]  ;;  %v183_v5 = vld [vmem:[%s152_s14 + $0x10] sm:$0xff]  ;;  %s209_s24 = int_to_ptr.vmem [resolvable:$true] %s208_s24 }
  0x30   : > { %v186_v3 = vadd.f32 %v185_v1, %v181_v0  ;;  %v187_v4 = vadd.f32 %v185_v1, %v182_v2  ;;  %v184_v6 = vld [vmem:[%s152_s14 + $0x18] sm:$0xff]  ;;  %s210_s20 = sshll.u32 %s207_s16, 4  ;;  %v188_v7 = vadd.f32 %v185_v1, %v183_v5  ;;  %s196_s13 = scalar_lea.sflag [#allocation4], %s622_s5  ;;  %s211_s20 = int_to_ptr.hbm [resolvable:$true] %s210_s20 }
  0x31   : > { %v189_v8 = vadd.f32 %v185_v1, %v184_v6  ;;  %s447_s19 = sshra.s32 %s211_s20, 4  ;;  %s453_s28 = scalar_lea.hbm %s673_s2, 64  ;;  %s448_s19 = int_to_ptr.hbm [resolvable:$true] %s447_s19 }
  0x32   : > { %191 = vst.msk [vmem:[%s178_s17] sm:$0xff] %vm190_vm0, %v186_v3  ;;  %s449_s25 = scalar_lea.hbm %s448_s19, 32  ;;  %p454_p0 = scmp.lt.s32.totalorder %s448_s19, %s673_s2 }
  0x33   : > { %192 = vst.msk [vmem:[%s178_s17 + $0x8] sm:$0xff] %vm190_vm0, %v187_v4  ;;  %p450_p4 = scmp.ne.s32.totalorder %s448_s19, %s449_s25  ;;  %p455_p7 = scmp.lt.s32.totalorder %s453_s28, %s449_s25 }
  0x34   : > { %193 = vst.msk [vmem:[%s178_s17 + $0x10] sm:$0xff] %vm190_vm0, %v188_v7 }
  0x35   : > { %194 = vst.msk [vmem:[%s178_s17 + $0x18] sm:$0xff] %vm190_vm0, %v189_v8  ;;  %p451_p6 = pnand %p450_p4, %p577_p11  ;;  %p456_p5 = por %p455_p7, %p454_p0 }
  0x37   : > { %p452_p13 = pneg %p451_p6 }
  0x39   : > { %p457_p8 = pnand %p456_p5, %p452_p13 }
  0x3b   : > { %460 = shalt.err (!%p457_p8)
}
  0x3c   : > { %s508_s3 = smov 128   ;;  %s509_s5 = smov 8  }
  0x3d   : > { %318 = dma.vmem_to_hbm [thread:$0]  (%p577_p11), %s209_s24, 512, %s211_s20, %s196_s13, %s508_s3, %s508_s3, %s509_s5  }
  0x3e PF: > { %s225_s6 = sand.u32 1, %s491_s9   ;;  %p680_p9 = scmp.ge.s32.totalorder %s503_s12, 2 }
  0x3f   : > { %s226_s7 = scalar_lea.sflag [#allocation4], %s225_s6 }
  0x40   : > { %p329_p10 = pnand %p680_p9, %p581_p12 }
  0x42   : > { %p330_p1 = pneg %p329_p10 }
  0x44   : > { %486 = dma.done.wait (%p330_p1), %s226_s7, 512  }
  0x45   : > { %488 = vsyncadd (%p330_p1), %s226_s7, 4294966784  ;;  %p16_p2 = scmp.ge.s32.totalorder %s550_s15, 4   ;;  %s681_s9 = smov %s495_s10 }
  0x46   : > { %s682_s10 = smov %s499_s11  ;;  %s683_s11 = smov %s562_s18 }
  0x47   : > { %s684_s12 = smov %s550_s15  ;;  %18 = sbr.rel (!%p16_p2) target bundleno = 6 (0x6), region = 77 }
  0x4c   :  { %232 = vsyncpa [#allocation3], 1 }
  0x4d   :  { %234 = vsyncpa [#allocation3 + $0x1], 1 }
  0x4e   :  { %235 = vsyncpa [#allocation6], 1 }
  0x4f   :  { %236 = vsyncpa [#allocation4], 1 }
  0x50   :  { %238 = vsyncpa [#allocation4 + $0x1], 1 }

</bundles_post_ra>
